<compile_context>
chip_gen: v6e
topology: v6e:2x2x1
jax: 0.10.0
libtpu: 0.0.40
codegen_flags: <defaults>
</compile_context>

<pallas_src>
import functools

import jax
import jax.numpy as jnp
from jax.experimental import pallas as pl
from jax.experimental.pallas import tpu as pltpu

LANE = 128


def _round_up(n, m):
    return ((n + m - 1) // m) * m


# ----------------------------------------------------------------------------- kernels

def _resblock_kernel_proj(x_ref, wc_ref, bc_ref, w2_ref, b2_ref, o_ref, *, hidden_pad):
    """Fused residual block with a Linear shortcut.

    wc = [w1 | ws] concatenated along the output-feature axis; one wide MXU pass
    produces both the hidden pre-activation and the shortcut projection.
    """
    x = x_ref[...]
    z = jnp.dot(x, wc_ref[...], preferred_element_type=jnp.float32) + bc_ref[...]
    h = jnp.maximum(z[:, :hidden_pad], 0.0)            # Linear1 + ReLU (128-aligned slice)
    res = z[:, hidden_pad:]                             # shortcut projection
    main = jnp.dot(h.astype(w2_ref.dtype), w2_ref[...],
                   preferred_element_type=jnp.float32) + b2_ref[...]
    o_ref[...] = jnp.maximum(main + res, 0.0).astype(o_ref.dtype)


def _resblock_kernel_identity(x_ref, w1_ref, b1_ref, w2_ref, b2_ref, o_ref):
    """Fused residual block with an identity shortcut (in_dim == out_dim)."""
    x = x_ref[...]
    h = jnp.maximum(jnp.dot(x, w1_ref[...], preferred_element_type=jnp.float32)
                    + b1_ref[...], 0.0)
    main = jnp.dot(h.astype(w2_ref.dtype), w2_ref[...],
                   preferred_element_type=jnp.float32) + b2_ref[...]
    o_ref[...] = jnp.maximum(main + x.astype(jnp.float32), 0.0).astype(o_ref.dtype)


# ----------------------------------------------------------------------------- prepare

def prepare_residual_block_params(params, *, compute_dtype=None):
    """One-time weight preprocessing: lane-pad, concat [w1|ws], cast to compute dtype.

    Call once and reuse the result for every forward call.
    """
    if compute_dtype is None:
        compute_dtype = jnp.bfloat16          # bf16-native MXU; accumulation stays f32 in-kernel
    compute_dtype = jnp.dtype(compute_dtype)

    in_dim, hidden = params["w1"].shape
    out_dim = params["w2"].shape[1]
    has_proj = "ws" in params
    if not has_proj and in_dim != out_dim:
        raise ValueError("identity shortcut requires in_dim == out_dim "
                         f"(got {in_dim} vs {out_dim}); provide 'ws'/'bs' for a projection.")

    in_pad = _round_up(in_dim, LANE)
    hid_pad = _round_up(hidden, LANE)
    out_pad = _round_up(out_dim, LANE)

    def pad2(a, r, c):
        pr, pc = r - a.shape[0], c - a.shape[1]
        return jnp.pad(a, ((0, pr), (0, pc))) if (pr or pc) else a

    w1_p = pad2(params["w1"], in_pad, hid_pad)
    b1_p = pad2(params["b1"], 1, hid_pad)
    if has_proj:
        ws_p = pad2(params["ws"], in_pad, out_pad)
        bs_p = pad2(params["bs"], 1, out_pad)
        wA = jnp.concatenate([w1_p, ws_p], axis=1)     # [w1 | ws]
        bA = jnp.concatenate([b1_p, bs_p], axis=1)     # [b1 | bs]
    else:
        wA, bA = w1_p, b1_p

    return {
        "wA": wA.astype(compute_dtype),
        "bA": bA.astype(jnp.float32),
        "w2": pad2(params["w2"], hid_pad, out_pad).astype(compute_dtype),
        "b2": pad2(params["b2"], 1, out_pad).astype(jnp.float32),
        "meta": dict(in_dim=in_dim, hidden=hidden, out_dim=out_dim,
                     in_pad=in_pad, hid_pad=hid_pad, out_pad=out_pad,
                     has_proj=has_proj, compute_dtype=compute_dtype),
    }


# ----------------------------------------------------------------------------- wrapper

def residual_block_forward(x, params, *, block_batch=None, out_dtype=None,
                           return_padded=False, compute_dtype=None):
    """Fused ResidualBlock forward.

    x:      [B, in_dim] (or [B, in_pad] already lane-padded)
    params: output of prepare_residual_block_params (raw param dicts are auto-prepared,
            but that re-pays the weight preprocessing on every call).
    return_padded: return the lane-dense [B_sub, out_pad] slab (no output slice copy)
            for feeding another fused layer.
    """
    if "meta" not in params:                       # convenience: accept raw params
        params = prepare_residual_block_params(params, compute_dtype=compute_dtype)
    meta = params["meta"]
    in_dim, out_dim = meta["in_dim"], meta["out_dim"]
    in_pad, hid_pad, out_pad = meta["in_pad"], meta["hid_pad"], meta["out_pad"]
    cdt = meta["compute_dtype"]
    has_proj = meta["has_proj"]

    B = x.shape[0]
    if x.shape[1] not in (in_dim, in_pad):
        raise ValueError(f"x feature dim {x.shape[1]} does not match in_dim={in_dim}")
    out_dtype = x.dtype if out_dtype is None else jnp.dtype(out_dtype)

    isz_c = jnp.dtype(cdt).itemsize
    isz_o = jnp.dtype(out_dtype).itemsize
    sub = 16 if isz_c == 2 else 8                  # sublane packing of the compute dtype

    # -- preprocess x: single cast, then zero-pad only what is needed.
    #    (K-dim padding must be exact zeros; batch boundary blocks rely on masked stores.)
    x_c = x if x.dtype == cdt else x.astype(cdt)
    B_sub = _round_up(B, sub)
    pad_r, pad_c = B_sub - B, in_pad - x_c.shape[1]
    x_p = jnp.pad(x_c, ((0, pad_r), (0, pad_c))) if (pad_r or pad_c) else x_c

    # -- batch tile: aim for >=4 grid steps (pipelining + v7x dual-TC), cap at 512 rows.
    if block_batch is None:
        tb = min(512, _round_up(max(pl.cdiv(B_sub, 4), sub), sub))
    else:
        tb = max(sub, _round_up(block_batch, sub))
    tb = min(tb, B_sub)

    wA, bA, w2, b2 = params["wA"], params["bA"], params["w2"], params["b2"]
    nc = wA.shape[1]

    # -- VMEM budgeting (generation-aware), including kernel intermediates.
    try:
        vmem_capacity = pltpu.get_tpu_info().vmem_capacity_bytes
    except Exception:
        vmem_capacity = 64 << 20                   # conservative: v7x per-TC VMEM
    vmem_cap = int(vmem_capacity) * 3 // 4         # headroom for Mosaic internal scratch

    weight_bytes = (in_pad * nc + hid_pad * out_pad) * isz_c + 8 * (nc + out_pad) * 4
    if weight_bytes > vmem_cap:
        # TODO(synk): add a K/N-tiled accumulator fallback for very wide layers.
        raise ValueError(
            f"resident weights need {weight_bytes / 2**20:.1f} MiB > VMEM budget "
            f"{vmem_cap / 2**20:.1f} MiB; layer too wide for the fused kernel.")

    def vmem_estimate(t):
        est = weight_bytes                         # single-buffered resident weights
        est += 2 * t * in_pad * isz_c              # x tile, double-buffered
        est += 2 * t * out_pad * isz_o             # out tile, double-buffered
        est += t * nc * 4                          # z  (widest live f32 intermediate)
        est += t * hid_pad * isz_c                 # h
        est += t * out_pad * 4                     # main (f32)
        return est

    while vmem_estimate(tb) > vmem_cap and tb > sub:
        tb = max(sub, _round_up(tb // 2, sub))

    grid = (pl.cdiv(B_sub, tb),)

    kernel = (functools.partial(_resblock_kernel_proj, hidden_pad=hid_pad)
              if has_proj else _resblock_kernel_identity)

    rows = grid[0] * tb
    cost = pl.CostEstimate(
        flops=2 * rows * (in_pad * nc + hid_pad * out_pad),
        transcendentals=0,
        bytes_accessed=(rows * in_pad * isz_c
                        + (in_pad * nc + hid_pad * out_pad) * isz_c
                        + (nc + out_pad) * 4
                        + rows * out_pad * isz_o))

    compiler_params = pltpu.CompilerParams(
        dimension_semantics=("parallel",),
        vmem_limit_bytes=int(min(vmem_cap, max(2 * vmem_estimate(tb), 32 << 20))),
    )

    def run(single_buffer_weights):
        if single_buffer_weights and hasattr(pl, "Buffered"):
            def w_spec(shape):                     # grid-invariant -> one resident buffer
                return pl.BlockSpec(shape, lambda i: (0, 0), pipeline_mode=pl.Buffered(1))
        else:
            def w_spec(shape):
                return pl.BlockSpec(shape, lambda i: (0, 0))
        in_specs = [
            pl.BlockSpec((tb, in_pad), lambda i: (i, 0)),   # x tile (pipelined over the grid)
            w_spec((in_pad, nc)),                           # [w1 | ws]  (or w1)
            w_spec((1, nc)),                                # [b1 | bs]  (or b1), f32
            w_spec((hid_pad, out_pad)),                     # w2
            w_spec((1, out_pad)),                           # b2, f32
        ]
        return pl.pallas_call(
            kernel,
            out_shape=jax.ShapeDtypeStruct((B_sub, out_pad), out_dtype),
            grid_spec=pltpu.PrefetchScalarGridSpec(
                num_scalar_prefetch=0, grid=grid,
                in_specs=in_specs,
                out_specs=pl.BlockSpec((tb, out_pad), lambda i: (i, 0))),
            compiler_params=compiler_params,
            cost_estimate=cost,
        )(x_p, wA, bA, w2, b2)

    try:
        out = run(True)
    except Exception:   # pipeline_mode / Buffered(1) unsupported on this jax version
        out = run(False)

    if return_padded:
        return out                                  # [B_sub, out_pad], lane-dense
    if B_sub != B or out_pad != out_dim:
        out = out[:B, :out_dim]
    return out


# ----------------------------------------------------------------------------- params

def init_residual_block_params(key, in_dim, out_dim, hidden_dim=None):
    """Deterministic synthetic init matching nn.Linear shapes (weights stored transposed)."""
    if hidden_dim is None:
        hidden_dim = max(in_dim, out_dim) // 2

    keys = jax.random.split(key, 6)

    def linear_init(kw, kb, fan_in, fan_out):
        bound = 1.0 / jnp.sqrt(jnp.float32(fan_in))
        w = jax.random.uniform(kw, (fan_in, fan_out), jnp.float32, -bound, bound)
        b = jax.random.uniform(kb, (1, fan_out), jnp.float32, -bound, bound)
        return w, b

    w1, b1 = linear_init(keys[0], keys[1], in_dim, hidden_dim)
    w2, b2 = linear_init(keys[2], keys[3], hidden_dim, out_dim)
    params = {"w1": w1, "b1": b1, "w2": w2, "b2": b2}

    if in_dim != out_dim:
        ws, bs = linear_init(keys[4], keys[5], in_dim, out_dim)
        params["ws"] = ws
        params["bs"] = bs
    return params


# ----------------------------------------------------------------------------- reference

def residual_block_ref(x, params):
    h = jnp.maximum(x @ params["w1"] + params["b1"], 0.0)
    main = h @ params["w2"] + params["b2"]
    res = (x @ params["ws"] + params["bs"]) if "ws" in params else x
    return jnp.maximum(main + res, 0.0)


# ----------------------------------------------------------------------------- main

if __name__ == "__main__":
    key = jax.random.PRNGKey(0)
    kx1, kp1, kx2, kp2, kx3, kp3 = jax.random.split(key, 6)

    # Case 1: in_dim != out_dim -> Linear shortcut (fused wide [w1|ws] matmul), exact f32 path.
    B, in_dim, out_dim = 8, 32, 64
    x = jax.random.normal(kx1, (B, in_dim), jnp.float32)
    params = init_residual_block_params(kp1, in_dim, out_dim)          # hidden = 32
    prep = prepare_residual_block_params(params, compute_dtype=jnp.float32)
    out = jax.block_until_ready(residual_block_forward(x, prep))
    ref = residual_block_ref(x, params)
    assert out.shape == (B, out_dim)
    assert jnp.allclose(out, ref, atol=1e-5, rtol=1e-5), "mismatch (proj shortcut, f32)"

    # Case 2: in_dim == out_dim -> identity shortcut, exact f32 path.
    B2, dim = 8, 32
    x2 = jax.random.normal(kx2, (B2, dim), jnp.float32)
    params2 = init_residual_block_params(kp2, dim, dim)                # hidden = 16
    prep2 = prepare_residual_block_params(params2, compute_dtype=jnp.float32)
    out2 = jax.block_until_ready(residual_block_forward(x2, prep2))
    ref2 = residual_block_ref(x2, params2)
    assert out2.shape == (B2, dim)
    assert jnp.allclose(out2, ref2, atol=1e-5, rtol=1e-5), "mismatch (identity shortcut, f32)"

    # Case 3: larger, non-multiple batch; default bf16 compute (f32 accumulation);
    # prepared weights reused across calls; >=4 grid steps + masked boundary block.
    B3, in3, out3_dim = 1003, 96, 160
    x3 = jax.random.normal(kx3, (B3, in3), jnp.float32)
    params3 = init_residual_block_params(kp3, in3, out3_dim)           # hidden = 80
    prep3 = prepare_residual_block_params(params3)                     # bf16 default
    out3 = jax.block_until_ready(residual_block_forward(x3, prep3))
    _ = jax.block_until_ready(residual_block_forward(x3, prep3))       # weight reuse, no re-prep
    ref3 = residual_block_ref(x3, params3)
    assert out3.shape == (B3, out3_dim)
    assert bool(jnp.all(jnp.isfinite(out3)))
    assert jnp.allclose(out3, ref3, atol=8e-2, rtol=8e-2), "mismatch (proj shortcut, bf16)"

    print("KERNEL_OK")
</pallas_src>

<mosaic_0001>
module attributes {stable_mosaic.version = 11 : i64} {
  func.func @_resblock_kernel_proj(%arg0: i32, %arg1: memref<8x128xf32, #tpu.memory_space<vmem>>, %arg2: memref<128x256xf32, #tpu.memory_space<vmem>>, %arg3: memref<1x256xf32, #tpu.memory_space<vmem>>, %arg4: memref<128x128xf32, #tpu.memory_space<vmem>>, %arg5: memref<1x128xf32, #tpu.memory_space<vmem>>, %arg6: memref<8x128xf32, #tpu.memory_space<vmem>>) attributes {dimension_semantics = [#tpu.dimension_semantics<parallel>], iteration_bounds = array<i64: 1>, scalar_prefetch = 0 : i64, scratch_operands = 0 : i64, tpu.core_type = #tpu.core_type<tc>, window_params = [{transform_indices = @transform_0, window_bounds = array<i64: 8, 128>}, {pipeline_mode = #tpu.pipeline_mode<synchronous>, transform_indices = @transform_1, window_bounds = array<i64: 128, 256>}, {pipeline_mode = #tpu.pipeline_mode<synchronous>, transform_indices = @transform_2, window_bounds = array<i64: 1, 256>}, {pipeline_mode = #tpu.pipeline_mode<synchronous>, transform_indices = @transform_3, window_bounds = array<i64: 128, 128>}, {pipeline_mode = #tpu.pipeline_mode<synchronous>, transform_indices = @transform_4, window_bounds = array<i64: 1, 128>}, {transform_indices = @transform_5, window_bounds = array<i64: 8, 128>}]} {
    %c0 = arith.constant 0 : index
    %c0_0 = arith.constant 0 : index
    %0 = vector.load %arg1[%c0, %c0_0] : memref<8x128xf32, #tpu.memory_space<vmem>>, vector<8x128xf32>
    %c0_1 = arith.constant 0 : index
    %c0_2 = arith.constant 0 : index
    %1 = vector.load %arg2[%c0_1, %c0_2] : memref<128x256xf32, #tpu.memory_space<vmem>>, vector<128x256xf32>
    %cst = arith.constant dense<0.000000e+00> : vector<8x256xf32>
    %2 = tpu.matmul %0, %1, %cst {dimension_numbers = #tpu.dot_dimension_numbers<[1], [0], [0], [1], [0, 0, 1, 1], [], []>} : vector<8x128xf32>, vector<128x256xf32>, vector<8x256xf32> -> vector<8x256xf32>
    %c0_3 = arith.constant 0 : index
    %c0_4 = arith.constant 0 : index
    %3 = vector.load %arg3[%c0_3, %c0_4] : memref<1x256xf32, #tpu.memory_space<vmem>>, vector<1x256xf32>
    %4 = vector.broadcast %3 : vector<1x256xf32> to vector<8x256xf32>
    %5 = arith.addf %2, %4 : vector<8x256xf32>
    %6 = vector.extract_strided_slice %5 {offsets = [0, 0], sizes = [8, 128], strides = [1, 1]} : vector<8x256xf32> to vector<8x128xf32>
    %cst_5 = arith.constant 0.000000e+00 : f32
    %7 = vector.broadcast %cst_5 : f32 to vector<8x128xf32>
    %8 = arith.maximumf %6, %7 : vector<8x128xf32>
    %9 = vector.extract_strided_slice %5 {offsets = [0, 128], sizes = [8, 128], strides = [1, 1]} : vector<8x256xf32> to vector<8x128xf32>
    %c0_6 = arith.constant 0 : index
    %c0_7 = arith.constant 0 : index
    %10 = vector.load %arg4[%c0_6, %c0_7] : memref<128x128xf32, #tpu.memory_space<vmem>>, vector<128x128xf32>
    %cst_8 = arith.constant dense<0.000000e+00> : vector<8x128xf32>
    %11 = tpu.matmul %8, %10, %cst_8 {dimension_numbers = #tpu.dot_dimension_numbers<[1], [0], [0], [1], [0, 0, 1, 1], [], []>} : vector<8x128xf32>, vector<128x128xf32>, vector<8x128xf32> -> vector<8x128xf32>
    %c0_9 = arith.constant 0 : index
    %c0_10 = arith.constant 0 : index
    %12 = vector.load %arg5[%c0_9, %c0_10] : memref<1x128xf32, #tpu.memory_space<vmem>>, vector<1x128xf32>
    %13 = vector.broadcast %12 : vector<1x128xf32> to vector<8x128xf32>
    %14 = arith.addf %11, %13 : vector<8x128xf32>
    %15 = arith.addf %14, %9 : vector<8x128xf32>
    %cst_11 = arith.constant 0.000000e+00 : f32
    %16 = vector.broadcast %cst_11 : f32 to vector<8x128xf32>
    %17 = arith.maximumf %15, %16 : vector<8x128xf32>
    %c0_12 = arith.constant 0 : index
    %c0_13 = arith.constant 0 : index
    %18 = vector.load %arg6[%c0_12, %c0_13] : memref<8x128xf32, #tpu.memory_space<vmem>>, vector<8x128xf32>
    tpu.vector_store %arg6[%c0_12, %c0_13], %17 {strides = array<i32>} : memref<8x128xf32, #tpu.memory_space<vmem>>, vector<8x128xf32>,
    return
  }
  func.func @transform_0(%arg0: i32) -> (i32, i32) {
    %c0_i32 = arith.constant 0 : i32
    %c0_i32_0 = arith.constant 0 : i32
    return %arg0, %c0_i32 : i32, i32
  }
  func.func @transform_1(%arg0: i32) -> (i32, i32) {
    %c0_i32 = arith.constant 0 : i32
    %c0_i32_0 = arith.constant 0 : i32
    %c0_i32_1 = arith.constant 0 : i32
    return %c0_i32, %c0_i32_0 : i32, i32
  }
  func.func @transform_2(%arg0: i32) -> (i32, i32) {
    %c0_i32 = arith.constant 0 : i32
    %c0_i32_0 = arith.constant 0 : i32
    %c0_i32_1 = arith.constant 0 : i32
    return %c0_i32, %c0_i32_0 : i32, i32
  }
  func.func @transform_3(%arg0: i32) -> (i32, i32) {
    %c0_i32 = arith.constant 0 : i32
    %c0_i32_0 = arith.constant 0 : i32
    %c0_i32_1 = arith.constant 0 : i32
    return %c0_i32, %c0_i32_0 : i32, i32
  }
  func.func @transform_4(%arg0: i32) -> (i32, i32) {
    %c0_i32 = arith.constant 0 : i32
    %c0_i32_0 = arith.constant 0 : i32
    %c0_i32_1 = arith.constant 0 : i32
    return %c0_i32, %c0_i32_0 : i32, i32
  }
  func.func @transform_5(%arg0: i32) -> (i32, i32) {
    %c0_i32 = arith.constant 0 : i32
    %c0_i32_0 = arith.constant 0 : i32
    return %arg0, %c0_i32 : i32, i32
  }
}

module attributes {stable_mosaic.version = 11 : i64} {
  func.func @_resblock_kernel_proj(%arg0: i32, %arg1: memref<8x128xf32, #tpu.memory_space<vmem>>, %arg2: memref<128x256xf32, #tpu.memory_space<vmem>>, %arg3: memref<1x256xf32, #tpu.memory_space<vmem>>, %arg4: memref<128x128xf32, #tpu.memory_space<vmem>>, %arg5: memref<1x128xf32, #tpu.memory_space<vmem>>, %arg6: memref<8x128xf32, #tpu.memory_space<vmem>>) attributes {dimension_semantics = [#tpu.dimension_semantics<parallel>], iteration_bounds = array<i64: 1>, scalar_prefetch = 0 : i64, scratch_operands = 0 : i64, tpu.core_type = #tpu.core_type<tc>, window_params = [{transform_indices = @transform_0, window_bounds = array<i64: 8, 128>}, {pipeline_mode = #tpu.pipeline_mode<synchronous>, transform_indices = @transform_1, window_bounds = array<i64: 128, 256>}, {pipeline_mode = #tpu.pipeline_mode<synchronous>, transform_indices = @transform_2, window_bounds = array<i64: 1, 256>}, {pipeline_mode = #tpu.pipeline_mode<synchronous>, transform_indices = @transform_3, window_bounds = array<i64: 128, 128>}, {pipeline_mode = #tpu.pipeline_mode<synchronous>, transform_indices = @transform_4, window_bounds = array<i64: 1, 128>}, {transform_indices = @transform_5, window_bounds = array<i64: 8, 128>}]} {
    %c0 = arith.constant 0 : index
    %c0_0 = arith.constant 0 : index
    %0 = vector.load %arg1[%c0, %c0_0] : memref<8x128xf32, #tpu.memory_space<vmem>>, vector<8x128xf32>
    %c0_1 = arith.constant 0 : index
    %c0_2 = arith.constant 0 : index
    %1 = vector.load %arg2[%c0_1, %c0_2] : memref<128x256xf32, #tpu.memory_space<vmem>>, vector<128x256xf32>
    %cst = arith.constant dense<0.000000e+00> : vector<8x256xf32>
    %2 = tpu.matmul %0, %1, %cst {dimension_numbers = #tpu.dot_dimension_numbers<[1], [0], [0], [1], [0, 0, 1, 1], [], []>} : vector<8x128xf32>, vector<128x256xf32>, vector<8x256xf32> -> vector<8x256xf32>
    %c0_3 = arith.constant 0 : index
    %c0_4 = arith.constant 0 : index
    %3 = vector.load %arg3[%c0_3, %c0_4] : memref<1x256xf32, #tpu.memory_space<vmem>>, vector<1x256xf32>
    %4 = vector.broadcast %3 : vector<1x256xf32> to vector<8x256xf32>
    %5 = arith.addf %2, %4 : vector<8x256xf32>
    %6 = vector.extract_strided_slice %5 {offsets = [0, 0], sizes = [8, 128], strides = [1, 1]} : vector<8x256xf32> to vector<8x128xf32>
    %cst_5 = arith.constant 0.000000e+00 : f32
    %7 = vector.broadcast %cst_5 : f32 to vector<8x128xf32>
    %8 = arith.maximumf %6, %7 : vector<8x128xf32>
    %9 = vector.extract_strided_slice %5 {offsets = [0, 128], sizes = [8, 128], strides = [1, 1]} : vector<8x256xf32> to vector<8x128xf32>
    %c0_6 = arith.constant 0 : index
    %c0_7 = arith.constant 0 : index
    %10 = vector.load %arg4[%c0_6, %c0_7] : memref<128x128xf32, #tpu.memory_space<vmem>>, vector<128x128xf32>
    %cst_8 = arith.constant dense<0.000000e+00> : vector<8x128xf32>
    %11 = tpu.matmul %8, %10, %cst_8 {dimension_numbers = #tpu.dot_dimension_numbers<[1], [0], [0], [1], [0, 0, 1, 1], [], []>} : vector<8x128xf32>, vector<128x128xf32>, vector<8x128xf32> -> vector<8x128xf32>
    %c0_9 = arith.constant 0 : index
    %c0_10 = arith.constant 0 : index
    %12 = vector.load %arg5[%c0_9, %c0_10] : memref<1x128xf32, #tpu.memory_space<vmem>>, vector<1x128xf32>
    %13 = vector.broadcast %12 : vector<1x128xf32> to vector<8x128xf32>
    %14 = arith.addf %11, %13 : vector<8x128xf32>
    %15 = arith.addf %14, %9 : vector<8x128xf32>
    %cst_11 = arith.constant 0.000000e+00 : f32
    %16 = vector.broadcast %cst_11 : f32 to vector<8x128xf32>
    %17 = arith.maximumf %15, %16 : vector<8x128xf32>
    %c0_12 = arith.constant 0 : index
    %c0_13 = arith.constant 0 : index
    %18 = vector.load %arg6[%c0_12, %c0_13] : memref<8x128xf32, #tpu.memory_space<vmem>>, vector<8x128xf32>
    tpu.vector_store %arg6[%c0_12, %c0_13], %17 {strides = array<i32>} : memref<8x128xf32, #tpu.memory_space<vmem>>, vector<8x128xf32>,
    return
  }
  func.func @transform_0(%arg0: i32) -> (i32, i32) {
    %c0_i32 = arith.constant 0 : i32
    %c0_i32_0 = arith.constant 0 : i32
    return %arg0, %c0_i32 : i32, i32
  }
  func.func @transform_1(%arg0: i32) -> (i32, i32) {
    %c0_i32 = arith.constant 0 : i32
    %c0_i32_0 = arith.constant 0 : i32
    %c0_i32_1 = arith.constant 0 : i32
    return %c0_i32, %c0_i32_0 : i32, i32
  }
  func.func @transform_2(%arg0: i32) -> (i32, i32) {
    %c0_i32 = arith.constant 0 : i32
    %c0_i32_0 = arith.constant 0 : i32
    %c0_i32_1 = arith.constant 0 : i32
    return %c0_i32, %c0_i32_0 : i32, i32
  }
  func.func @transform_3(%arg0: i32) -> (i32, i32) {
    %c0_i32 = arith.constant 0 : i32
    %c0_i32_0 = arith.constant 0 : i32
    %c0_i32_1 = arith.constant 0 : i32
    return %c0_i32, %c0_i32_0 : i32, i32
  }
  func.func @transform_4(%arg0: i32) -> (i32, i32) {
    %c0_i32 = arith.constant 0 : i32
    %c0_i32_0 = arith.constant 0 : i32
    %c0_i32_1 = arith.constant 0 : i32
    return %c0_i32, %c0_i32_0 : i32, i32
  }
  func.func @transform_5(%arg0: i32) -> (i32, i32) {
    %c0_i32 = arith.constant 0 : i32
    %c0_i32_0 = arith.constant 0 : i32
    return %arg0, %c0_i32 : i32, i32
  }
}

</mosaic_0001>

<bundles_post_ra>
// kernel: tpu_custom_call.1
= control target key start
LH: loop header
LB: loop body
LE: loop exit
PB: predicated region body
PF: predicated region fallthrough
CT: control target
= control target key end

     0   :  { %10 = vsyncpa [#allocation3], 0  ;;  %s514_s0 = inlined_call_operand.hbm [shape: f32[8,128], index: 0, kind: input, shape index: {}]   ;;  %s515_s1 = inlined_call_operand.hbm [shape: f32[128,256], index: 1, kind: input, shape index: {}]   ;;  %s516_s2 = inlined_call_operand.vmem [shape: f32[1,256], index: 2, kind: input, shape index: {}]   ;;  %s517_s3 = inlined_call_operand.hbm [shape: f32[128,128], index: 3, kind: input, shape index: {}]   ;;  %s518_s4 = inlined_call_operand.vmem [shape: f32[1,128], index: 4, kind: input, shape index: {}]   ;;  %s519_s5 = inlined_call_operand.hbm [shape: f32[8,128], index: 5, kind: output, shape index: {}]  }
   0x1   :  { %11 = vsyncpa [#allocation6], 0 }
   0x2   :  { %12 = vsyncpa [#allocation4], 0  ;;  %s438_s18 = smov [#allocation5]  }
   0x3   :  { %s28_s19 = sshll.u32 %s438_s18, 4  ;;  %s29_s19 = int_to_ptr.vmem [resolvable:$true] %s28_s19 }
   0x4   :  { %s360_s20 = scalar_lea.vmem %s29_s19, 4096  ;;  %p365_p1 = scmp.lt.s32.totalorder %s29_s19, %s29_s19 }
   0x5   :  { %p361_p0 = scmp.ne.s32.totalorder %s29_s19, %s360_s20  ;;  %p366_p2 = scmp.lt.s32.totalorder %s360_s20, %s360_s20 }
   0x7   :  { %p367_p3 = por %p366_p2, %p365_p1 }
   0x9   :  { %p368_p4 = pnand %p367_p3, %p361_p0 }
   0xb   :  { %371 = shalt.err (!%p368_p4)
}
   0xc   :  { %s439_s21 = smov 256   ;;  %s440_s22 = smov 16  }
   0xd   :  { %34 = dma.hbm_to_vmem [thread:$0]  %s515_s1, 4096, %s29_s19, [#allocation6], %s439_s21, %s439_s21, %s440_s22  }
   0xe   :  { %s441_s25 = smov [#allocation2]   ;;  %s442_s27 = smov [#allocation7]  }
   0xf   :  { %s19_s26 = sshll.u32 %s441_s25, 4  ;;  %s42_s28 = sshll.u32 %s442_s27, 4  ;;  %s20_s26 = int_to_ptr.vmem [resolvable:$true] %s19_s26  ;;  %s43_s28 = int_to_ptr.vmem [resolvable:$true] %s42_s28 }
  0x10   :  { %s380_s29 = scalar_lea.vmem %s20_s26, 128  ;;  %p385_p6 = scmp.lt.s32.totalorder %s20_s26, %s20_s26 }
  0x11   :  { %p381_p5 = scmp.ne.s32.totalorder %s20_s26, %s380_s29  ;;  %p386_p7 = scmp.lt.s32.totalorder %s380_s29, %s380_s29 }
  0x13   :  { %p387_p8 = por %p386_p7, %p385_p6 }
  0x15   :  { %p388_p9 = pnand %p387_p8, %p381_p5 }
  0x17   :  { %391 = shalt.err (!%p388_p9)
}
  0x18   :  { %22 = dma.hbm_to_vmem [thread:$0]  %s514_s0, 128, %s20_s26, [#allocation3]  }
  0x19   :  { %s400_s7 = scalar_lea.vmem %s43_s28, 2048  ;;  %p405_p11 = scmp.lt.s32.totalorder %s43_s28, %s43_s28 }
  0x1a   :  { %p401_p10 = scmp.ne.s32.totalorder %s43_s28, %s400_s7  ;;  %p406_p12 = scmp.lt.s32.totalorder %s400_s7, %s400_s7 }
  0x1c   :  { %p407_p13 = por %p406_p12, %p405_p11 }
  0x1e   :  { %p408_p0 = pnand %p407_p13, %p401_p10 }
  0x20   :  { %411 = shalt.err (!%p408_p0)
}
  0x21   :  { %s443_s1 = smov 128   ;;  %s444_s8 = smov 8  }
  0x22   :  { %48 = dma.hbm_to_vmem [thread:$0]  %s517_s3, 2048, %s43_s28, [#allocation6], %s443_s1, %s443_s1, %s444_s8  }
  0x23   :  { %432 = dma.done.wait [#allocation3], 128  }
  0x24   :  { %433 = vsyncadd [#allocation3], 4294967168 }
  0x25   :  { %434 = dma.done.wait [#allocation6], 6144  }
  0x26   :  { %435 = vsyncadd [#allocation6], 4294961152  ;;  %v445_v0 = vmov 0.0   ;;  %v92_v1 = vld [vmem:[#allocation5 + $0xf8] sm:$0xff]  ;;  %v91_v2 = vld [vmem:[#allocation5 + $0xf0] sm:$0xff]  ;;  %vm446_vm0 = vmmov 0   ;;  %v95_v50 = vlaneseq }
  0x27   :  { %169 = vmatprep.mubr.f32.mxu0 %v445_v0  ;;  %307 = vmatprep.subr.mxu1 %v445_v0  ;;  %v90_v3 = vld [vmem:[#allocation5 + $0xe8] sm:$0xff]  ;;  %v89_v4 = vld [vmem:[#allocation5 + $0xe0] sm:$0xff]  ;;  %v88_v5 = vld [vmem:[#allocation5 + $0xd8] sm:$0xff]  ;;  %s447_s13 = smov [#allocation8]  }
  0x28   :  { %105 = vmatprep.subr.mxu0 %v92_v1  ;;  %v87_v6 = vld [vmem:[#allocation5 + $0xd0] sm:$0xff]  ;;  %v86_v7 = vld [vmem:[#allocation5 + $0xc8] sm:$0xff]  ;;  %v85_v8 = vld [vmem:[#allocation5 + $0xc0] sm:$0xff]  ;;  %339 = vmatprep.mubr.msk.f32.mxu1 %vm446_vm0, %v445_v0  ;;  %v96_v51 = vshrl.u32 %v95_v50, 7  ;;  %s279_s14 = sshll.u32 %s447_s13, 4  ;;  %s280_s14 = int_to_ptr.vmem [resolvable:$true] %s279_s14 }
  0x29   :  { %106 = vmatpush1.msra.mxu0 %v91_v2  ;;  %v84_v9 = vld [vmem:[#allocation5 + $0xb8] sm:$0xff]  ;;  %v83_v10 = vld [vmem:[#allocation5 + $0xb0] sm:$0xff]  ;;  %v82_v11 = vld [vmem:[#allocation5 + $0xa8] sm:$0xff]  ;;  %p417_p2 = scmp.lt.s32.totalorder %s280_s14, %s280_s14 }
  0x2a   :  { %107 = vmatprep.subr.mxu0 %v90_v3  ;;  %v81_v12 = vld [vmem:[#allocation5 + $0xa0] sm:$0xff]  ;;  %v80_v13 = vld [vmem:[#allocation5 + $0x98] sm:$0xff]  ;;  %v79_v14 = vld [vmem:[#allocation5 + $0x90] sm:$0xff]  ;;  %v97_v52 = vsub.s32 0, %v96_v51  ;;  %v101_v58 = vsub.s32 1, %v96_v51 }
  0x2b   :  { %108 = vmatpush1.msra.mxu0 %v89_v4  ;;  %v192_v15 = vld [vmem:[#allocation7 + $0x78] sm:$0xff]  ;;  %v191_v16 = vld [vmem:[#allocation7 + $0x70] sm:$0xff]  ;;  %v78_v17 = vld [vmem:[#allocation5 + $0x88] sm:$0xff] }
  0x2c   :  { %109 = vmatprep.subr.mxu0 %v88_v5  ;;  %308 = vmatpush3.msra.mxu1 %v192_v15  ;;  %v77_v18 = vld [vmem:[#allocation5 + $0x80] sm:$0xff]  ;;  %v190_v19 = vld [vmem:[#allocation7 + $0x68] sm:$0xff]  ;;  %v76_v20 = vld [vmem:[#allocation5 + $0x78] sm:$0xff] }
  0x2d   :  { %110 = vmatpush1.msra.mxu0 %v87_v6  ;;  %309 = vmatprep.subr.mxu1 %v445_v0  ;;  %v75_v21 = vld [vmem:[#allocation5 + $0x70] sm:$0xff]  ;;  %v189_v22 = vld [vmem:[#allocation7 + $0x60] sm:$0xff]  ;;  %v74_v23 = vld [vmem:[#allocation5 + $0x68] sm:$0xff] }
  0x2e   :  { %111 = vmatprep.subr.mxu0 %v86_v7  ;;  %310 = vmatpush3.msra.mxu1 %v191_v16  ;;  %v73_v24 = vld [vmem:[#allocation5 + $0x60] sm:$0xff]  ;;  %v188_v25 = vld [vmem:[#allocation7 + $0x58] sm:$0xff]  ;;  %v71_v27 = vld [vmem:[#allocation5 + $0x50] sm:$0xff] }
  0x2f   :  { %112 = vmatpush1.msra.mxu0 %v85_v8  ;;  %311 = vmatprep.subr.mxu1 %v445_v0  ;;  %v72_v26 = vld [vmem:[#allocation5 + $0x58] sm:$0xff]  ;;  %v187_v28 = vld [vmem:[#allocation7 + $0x50] sm:$0xff]  ;;  %v70_v29 = vld [vmem:[#allocation5 + $0x48] sm:$0xff] }
  0x30   :  { %113 = vmatprep.subr.mxu0 %v84_v9  ;;  %312 = vmatpush3.msra.mxu1 %v190_v19  ;;  %v69_v30 = vld [vmem:[#allocation5 + $0x40] sm:$0xff]  ;;  %v186_v31 = vld [vmem:[#allocation7 + $0x48] sm:$0xff]  ;;  %v68_v32 = vld [vmem:[#allocation5 + $0x38] sm:$0xff] }
  0x31   :  { %114 = vmatpush1.msra.mxu0 %v83_v10  ;;  %313 = vmatprep.subr.mxu1 %v445_v0  ;;  %v67_v33 = vld [vmem:[#allocation5 + $0x30] sm:$0xff]  ;;  %v185_v34 = vld [vmem:[#allocation7 + $0x40] sm:$0xff]  ;;  %v66_v35 = vld [vmem:[#allocation5 + $0x28] sm:$0xff] }
  0x32   :  { %115 = vmatprep.subr.mxu0 %v82_v11  ;;  %314 = vmatpush3.msra.mxu1 %v189_v22  ;;  %v65_v36 = vld [vmem:[#allocation5 + $0x20] sm:$0xff]  ;;  %v184_v37 = vld [vmem:[#allocation7 + $0x38] sm:$0xff]  ;;  %v63_v39 = vld [vmem:[#allocation5 + $0x10] sm:$0xff] }
  0x33   :  { %116 = vmatpush1.msra.mxu0 %v81_v12  ;;  %315 = vmatprep.subr.mxu1 %v445_v0  ;;  %v64_v38 = vld [vmem:[#allocation5 + $0x18] sm:$0xff]  ;;  %v183_v40 = vld [vmem:[#allocation7 + $0x30] sm:$0xff]  ;;  %v62_v41 = vld [vmem:[#allocation5 + $0x8] sm:$0xff] }
  0x34   :  { %117 = vmatprep.subr.mxu0 %v80_v13  ;;  %316 = vmatpush3.msra.mxu1 %v188_v25  ;;  %v61_v42 = vld [vmem:[#allocation5] sm:$0xff]  ;;  %v182_v43 = vld [vmem:[#allocation7 + $0x28] sm:$0xff]  ;;  %v60_v44 = vld [vmem:[#allocation2] sm:$0xff] }
  0x35   :  { %118 = vmatpush1.msra.mxu0 %v79_v14  ;;  %317 = vmatprep.subr.mxu1 %v445_v0  ;;  %v181_v45 = vld [vmem:[#allocation7 + $0x20] sm:$0xff]  ;;  %v180_v46 = vld [vmem:[#allocation7 + $0x18] sm:$0xff]  ;;  %v179_v47 = vld [vmem:[#allocation7 + $0x10] sm:$0xff] }
  0x36   :  { %119 = vmatprep.subr.mxu0 %v78_v17  ;;  %318 = vmatpush3.msra.mxu1 %v187_v28  ;;  %v178_v48 = vld [vmem:[#allocation7 + $0x8] sm:$0xff]  ;;  %v177_v49 = vld [vmem:[#allocation7] sm:$0xff]  ;;  %v93_v53 = vld [vmem:[%s516_s2] sm:$0x3]  ;;  %s412_s2 = scalar_lea.vmem %s280_s14, 128 }
  0x37   :  { %120 = vmatpush1.msra.mxu0 %v77_v18  ;;  %319 = vmatprep.subr.mxu1 %v445_v0  ;;  %v98_v54 = vrot.slane %v93_v53, %v97_v52  ;;  %v102_v59 = vrot.slane %v93_v53, %v101_v58  ;;  %v289_v61 = vld [vmem:[%s518_s4] ss:$0 sm:$0xff]  ;;  %p413_p1 = scmp.ne.s32.totalorder %s280_s14, %s412_s2  ;;  %p418_p3 = scmp.lt.s32.totalorder %s412_s2, %s412_s2 }
  0x38   :  { %121 = vmatprep.subr.mxu0 %v76_v20  ;;  %320 = vmatpush3.msra.mxu1 %v186_v31 }
  0x39   :  { %122 = vmatpush1.msra.mxu0 %v75_v21  ;;  %321 = vmatprep.subr.mxu1 %v445_v0  ;;  %p419_p4 = por %p418_p3, %p417_p2 }
  0x3a   :  { %123 = vmatprep.subr.mxu0 %v74_v23  ;;  %322 = vmatpush3.msra.mxu1 %v185_v34 }
  0x3b   :  { %124 = vmatpush1.msra.mxu0 %v73_v24  ;;  %323 = vmatprep.subr.mxu1 %v445_v0  ;;  %p420_p5 = pnand %p419_p4, %p413_p1 }
  0x3c   :  { %125 = vmatprep.subr.mxu0 %v72_v26  ;;  %324 = vmatpush3.msra.mxu1 %v184_v37 }
  0x3d   :  { %126 = vmatpush1.msra.mxu0 %v71_v27  ;;  %325 = vmatprep.subr.mxu1 %v445_v0 }
  0x3e   :  { %127 = vmatprep.subr.mxu0 %v70_v29  ;;  %326 = vmatpush3.msra.mxu1 %v183_v40 }
  0x3f   :  { %128 = vmatpush1.msra.mxu0 %v69_v30  ;;  %327 = vmatprep.subr.mxu1 %v445_v0 }
  0x40   :  { %129 = vmatprep.subr.mxu0 %v68_v32  ;;  %328 = vmatpush3.msra.mxu1 %v182_v43 }
  0x41   :  { %130 = vmatpush1.msra.mxu0 %v67_v33  ;;  %329 = vmatprep.subr.mxu1 %v445_v0 }
  0x42   :  { %131 = vmatprep.subr.mxu0 %v66_v35  ;;  %330 = vmatpush3.msra.mxu1 %v181_v45 }
  0x43   :  { %132 = vmatpush1.msra.mxu0 %v65_v36  ;;  %331 = vmatprep.subr.mxu1 %v445_v0 }
  0x44   :  { %133 = vmatprep.subr.mxu0 %v64_v38  ;;  %332 = vmatpush3.msra.mxu1 %v180_v46 }
  0x45   :  { %134 = vmatpush1.msra.mxu0 %v63_v39  ;;  %333 = vmatprep.subr.mxu1 %v445_v0 }
  0x46   :  { %135 = vmatprep.subr.mxu0 %v62_v41  ;;  %334 = vmatpush3.msra.mxu1 %v179_v47 }
  0x47   :  { %136 = vmatpush1.msra.mxu0 %v61_v42  ;;  %335 = vmatprep.subr.mxu1 %v445_v0 }
  0x48   :  { %170 = vmatmul.mubr.f32.vlgmr.msra.gmra.mxu0 %v60_v44  ;;  %336 = vmatpush3.msra.mxu1 %v178_v48 }
  0x49   :  { %337 = vmatprep.subr.mxu1 %v445_v0 }
  0x4a   :  { %338 = vmatpush3.msra.mxu1 %v177_v49 }
 0x108   :  { %v171_v55 = vpop.f32.mrf.mxu0 }
 0x109   :  { %v172_v56 = vadd.f32 %v171_v55, %v98_v54 }
 0x10a   :  { %v173_v60 = vpop.f32.mrf.mxu0 }
 0x10b   :  { %v176_v57 = vmax.f32 %v172_v56, 0.0  ;;  %v174_v63 = vadd.f32 %v173_v60, %v102_v59 }
 0x10d   :  { %340 = vmatmul.mubr.f32.vlgmr.msra.gmra.mxu1 %v176_v57 }
 0x1cd   :  { %v266_v62 = vpop.f32.mrf.mxu1 }
 0x1ce   :  { %v267_v0 = vadd.f32 %v289_v61, %v266_v62 }
 0x1cf   :  { %v341_v1 = vpop.f32.mrf.mxu1 }
 0x1d0   :  { %v270_v2 = vadd.f32 %v267_v0, %v174_v63 }
 0x1d2   :  { %v271_v3 = vmax.f32 %v270_v2, 0.0 }
 0x1d4   :  { %272 = vst [vmem:[#allocation8] sm:$0xff] %v271_v3 }
 0x1d5   :  { %423 = shalt.err (!%p420_p5)
}
 0x1d6   :  { %282 = dma.vmem_to_hbm [thread:$0]  %s280_s14, 128, %s519_s5, [#allocation4]  }
 0x1d7   :  { %436 = dma.done.wait [#allocation4], 128  }
 0x1d8   :  { %437 = vsyncadd [#allocation4], 4294967168 }
 0x1d9   :  { %286 = vsyncpa [#allocation3], 1 }
 0x1da   :  { %287 = vsyncpa [#allocation6], 1 }
 0x1db   :  { %288 = vsyncpa [#allocation4], 1 }

// kernel: tpu_custom_call.1
= control target key start
LH: loop header
LB: loop body
LE: loop exit
PB: predicated region body
PF: predicated region fallthrough
CT: control target
= control target key end

     0   :  { %10 = vsyncpa [#allocation3], 0  ;;  %s514_s0 = inlined_call_operand.hbm [shape: f32[8,128], index: 0, kind: input, shape index: {}]   ;;  %s515_s1 = inlined_call_operand.hbm [shape: f32[128,256], index: 1, kind: input, shape index: {}]   ;;  %s516_s2 = inlined_call_operand.vmem [shape: f32[1,256], index: 2, kind: input, shape index: {}]   ;;  %s517_s3 = inlined_call_operand.hbm [shape: f32[128,128], index: 3, kind: input, shape index: {}]   ;;  %s518_s4 = inlined_call_operand.vmem [shape: f32[1,128], index: 4, kind: input, shape index: {}]   ;;  %s519_s5 = inlined_call_operand.hbm [shape: f32[8,128], index: 5, kind: output, shape index: {}]  }
   0x1   :  { %11 = vsyncpa [#allocation6], 0 }
   0x2   :  { %12 = vsyncpa [#allocation4], 0  ;;  %s438_s18 = smov [#allocation5]  }
   0x3   :  { %s28_s19 = sshll.u32 %s438_s18, 4  ;;  %s29_s19 = int_to_ptr.vmem [resolvable:$true] %s28_s19 }
   0x4   :  { %s360_s20 = scalar_lea.vmem %s29_s19, 4096  ;;  %p365_p1 = scmp.lt.s32.totalorder %s29_s19, %s29_s19 }
   0x5   :  { %p361_p0 = scmp.ne.s32.totalorder %s29_s19, %s360_s20  ;;  %p366_p2 = scmp.lt.s32.totalorder %s360_s20, %s360_s20 }
   0x7   :  { %p367_p3 = por %p366_p2, %p365_p1 }
   0x9   :  { %p368_p4 = pnand %p367_p3, %p361_p0 }
   0xb   :  { %371 = shalt.err (!%p368_p4)
}
   0xc   :  { %s439_s21 = smov 256   ;;  %s440_s22 = smov 16  }
   0xd   :  { %34 = dma.hbm_to_vmem [thread:$0]  %s515_s1, 4096, %s29_s19, [#allocation6], %s439_s21, %s439_s21, %s440_s22  }
   0xe   :  { %s441_s25 = smov [#allocation2]   ;;  %s442_s27 = smov [#allocation7]  }
   0xf   :  { %s19_s26 = sshll.u32 %s441_s25, 4  ;;  %s42_s28 = sshll.u32 %s442_s27, 4  ;;  %s20_s26 = int_to_ptr.vmem [resolvable:$true] %s19_s26  ;;  %s43_s28 = int_to_ptr.vmem [resolvable:$true] %s42_s28 }
  0x10   :  { %s380_s29 = scalar_lea.vmem %s20_s26, 128  ;;  %p385_p6 = scmp.lt.s32.totalorder %s20_s26, %s20_s26 }
  0x11   :  { %p381_p5 = scmp.ne.s32.totalorder %s20_s26, %s380_s29  ;;  %p386_p7 = scmp.lt.s32.totalorder %s380_s29, %s380_s29 }
  0x13   :  { %p387_p8 = por %p386_p7, %p385_p6 }
  0x15   :  { %p388_p9 = pnand %p387_p8, %p381_p5 }
  0x17   :  { %391 = shalt.err (!%p388_p9)
}
  0x18   :  { %22 = dma.hbm_to_vmem [thread:$0]  %s514_s0, 128, %s20_s26, [#allocation3]  }
  0x19   :  { %s400_s7 = scalar_lea.vmem %s43_s28, 2048  ;;  %p405_p11 = scmp.lt.s32.totalorder %s43_s28, %s43_s28 }
  0x1a   :  { %p401_p10 = scmp.ne.s32.totalorder %s43_s28, %s400_s7  ;;  %p406_p12 = scmp.lt.s32.totalorder %s400_s7, %s400_s7 }
  0x1c   :  { %p407_p13 = por %p406_p12, %p405_p11 }
  0x1e   :  { %p408_p0 = pnand %p407_p13, %p401_p10 }
  0x20   :  { %411 = shalt.err (!%p408_p0)
}
  0x21   :  { %s443_s1 = smov 128   ;;  %s444_s8 = smov 8  }
  0x22   :  { %48 = dma.hbm_to_vmem [thread:$0]  %s517_s3, 2048, %s43_s28, [#allocation6], %s443_s1, %s443_s1, %s444_s8  }
  0x23   :  { %432 = dma.done.wait [#allocation3], 128  }
  0x24   :  { %433 = vsyncadd [#allocation3], 4294967168 }
  0x25   :  { %434 = dma.done.wait [#allocation6], 6144  }
  0x26   :  { %435 = vsyncadd [#allocation6], 4294961152  ;;  %v445_v0 = vmov 0.0   ;;  %v92_v1 = vld [vmem:[#allocation5 + $0xf8] sm:$0xff]  ;;  %v91_v2 = vld [vmem:[#allocation5 + $0xf0] sm:$0xff]  ;;  %vm446_vm0 = vmmov 0   ;;  %v95_v50 = vlaneseq }
  0x27   :  { %169 = vmatprep.mubr.f32.mxu0 %v445_v0  ;;  %307 = vmatprep.subr.mxu1 %v445_v0  ;;  %v90_v3 = vld [vmem:[#allocation5 + $0xe8] sm:$0xff]  ;;  %v89_v4 = vld [vmem:[#allocation5 + $0xe0] sm:$0xff]  ;;  %v88_v5 = vld [vmem:[#allocation5 + $0xd8] sm:$0xff]  ;;  %s447_s13 = smov [#allocation8]  }
  0x28   :  { %105 = vmatprep.subr.mxu0 %v92_v1  ;;  %v87_v6 = vld [vmem:[#allocation5 + $0xd0] sm:$0xff]  ;;  %v86_v7 = vld [vmem:[#allocation5 + $0xc8] sm:$0xff]  ;;  %v85_v8 = vld [vmem:[#allocation5 + $0xc0] sm:$0xff]  ;;  %339 = vmatprep.mubr.msk.f32.mxu1 %vm446_vm0, %v445_v0  ;;  %v96_v51 = vshrl.u32 %v95_v50, 7  ;;  %s279_s14 = sshll.u32 %s447_s13, 4  ;;  %s280_s14 = int_to_ptr.vmem [resolvable:$true] %s279_s14 }
  0x29   :  { %106 = vmatpush1.msra.mxu0 %v91_v2  ;;  %v84_v9 = vld [vmem:[#allocation5 + $0xb8] sm:$0xff]  ;;  %v83_v10 = vld [vmem:[#allocation5 + $0xb0] sm:$0xff]  ;;  %v82_v11 = vld [vmem:[#allocation5 + $0xa8] sm:$0xff]  ;;  %p417_p2 = scmp.lt.s32.totalorder %s280_s14, %s280_s14 }
  0x2a   :  { %107 = vmatprep.subr.mxu0 %v90_v3  ;;  %v81_v12 = vld [vmem:[#allocation5 + $0xa0] sm:$0xff]  ;;  %v80_v13 = vld [vmem:[#allocation5 + $0x98] sm:$0xff]  ;;  %v79_v14 = vld [vmem:[#allocation5 + $0x90] sm:$0xff]  ;;  %v97_v52 = vsub.s32 0, %v96_v51  ;;  %v101_v58 = vsub.s32 1, %v96_v51 }
  0x2b   :  { %108 = vmatpush1.msra.mxu0 %v89_v4  ;;  %v192_v15 = vld [vmem:[#allocation7 + $0x78] sm:$0xff]  ;;  %v191_v16 = vld [vmem:[#allocation7 + $0x70] sm:$0xff]  ;;  %v78_v17 = vld [vmem:[#allocation5 + $0x88] sm:$0xff] }
  0x2c   :  { %109 = vmatprep.subr.mxu0 %v88_v5  ;;  %308 = vmatpush3.msra.mxu1 %v192_v15  ;;  %v77_v18 = vld [vmem:[#allocation5 + $0x80] sm:$0xff]  ;;  %v190_v19 = vld [vmem:[#allocation7 + $0x68] sm:$0xff]  ;;  %v76_v20 = vld [vmem:[#allocation5 + $0x78] sm:$0xff] }
  0x2d   :  { %110 = vmatpush1.msra.mxu0 %v87_v6  ;;  %309 = vmatprep.subr.mxu1 %v445_v0  ;;  %v75_v21 = vld [vmem:[#allocation5 + $0x70] sm:$0xff]  ;;  %v189_v22 = vld [vmem:[#allocation7 + $0x60] sm:$0xff]  ;;  %v74_v23 = vld [vmem:[#allocation5 + $0x68] sm:$0xff] }
  0x2e   :  { %111 = vmatprep.subr.mxu0 %v86_v7  ;;  %310 = vmatpush3.msra.mxu1 %v191_v16  ;;  %v73_v24 = vld [vmem:[#allocation5 + $0x60] sm:$0xff]  ;;  %v188_v25 = vld [vmem:[#allocation7 + $0x58] sm:$0xff]  ;;  %v71_v27 = vld [vmem:[#allocation5 + $0x50] sm:$0xff] }
  0x2f   :  { %112 = vmatpush1.msra.mxu0 %v85_v8  ;;  %311 = vmatprep.subr.mxu1 %v445_v0  ;;  %v72_v26 = vld [vmem:[#allocation5 + $0x58] sm:$0xff]  ;;  %v187_v28 = vld [vmem:[#allocation7 + $0x50] sm:$0xff]  ;;  %v70_v29 = vld [vmem:[#allocation5 + $0x48] sm:$0xff] }
  0x30   :  { %113 = vmatprep.subr.mxu0 %v84_v9  ;;  %312 = vmatpush3.msra.mxu1 %v190_v19  ;;  %v69_v30 = vld [vmem:[#allocation5 + $0x40] sm:$0xff]  ;;  %v186_v31 = vld [vmem:[#allocation7 + $0x48] sm:$0xff]  ;;  %v68_v32 = vld [vmem:[#allocation5 + $0x38] sm:$0xff] }
  0x31   :  { %114 = vmatpush1.msra.mxu0 %v83_v10  ;;  %313 = vmatprep.subr.mxu1 %v445_v0  ;;  %v67_v33 = vld [vmem:[#allocation5 + $0x30] sm:$0xff]  ;;  %v185_v34 = vld [vmem:[#allocation7 + $0x40] sm:$0xff]  ;;  %v66_v35 = vld [vmem:[#allocation5 + $0x28] sm:$0xff] }
  0x32   :  { %115 = vmatprep.subr.mxu0 %v82_v11  ;;  %314 = vmatpush3.msra.mxu1 %v189_v22  ;;  %v65_v36 = vld [vmem:[#allocation5 + $0x20] sm:$0xff]  ;;  %v184_v37 = vld [vmem:[#allocation7 + $0x38] sm:$0xff]  ;;  %v63_v39 = vld [vmem:[#allocation5 + $0x10] sm:$0xff] }
  0x33   :  { %116 = vmatpush1.msra.mxu0 %v81_v12  ;;  %315 = vmatprep.subr.mxu1 %v445_v0  ;;  %v64_v38 = vld [vmem:[#allocation5 + $0x18] sm:$0xff]  ;;  %v183_v40 = vld [vmem:[#allocation7 + $0x30] sm:$0xff]  ;;  %v62_v41 = vld [vmem:[#allocation5 + $0x8] sm:$0xff] }
  0x34   :  { %117 = vmatprep.subr.mxu0 %v80_v13  ;;  %316 = vmatpush3.msra.mxu1 %v188_v25  ;;  %v61_v42 = vld [vmem:[#allocation5] sm:$0xff]  ;;  %v182_v43 = vld [vmem:[#allocation7 + $0x28] sm:$0xff]  ;;  %v60_v44 = vld [vmem:[#allocation2] sm:$0xff] }
  0x35   :  { %118 = vmatpush1.msra.mxu0 %v79_v14  ;;  %317 = vmatprep.subr.mxu1 %v445_v0  ;;  %v181_v45 = vld [vmem:[#allocation7 + $0x20] sm:$0xff]  ;;  %v180_v46 = vld [vmem:[#allocation7 + $0x18] sm:$0xff]  ;;  %v179_v47 = vld [vmem:[#allocation7 + $0x10] sm:$0xff] }
  0x36   :  { %119 = vmatprep.subr.mxu0 %v78_v17  ;;  %318 = vmatpush3.msra.mxu1 %v187_v28  ;;  %v178_v48 = vld [vmem:[#allocation7 + $0x8] sm:$0xff]  ;;  %v177_v49 = vld [vmem:[#allocation7] sm:$0xff]  ;;  %v93_v53 = vld [vmem:[%s516_s2] sm:$0x3]  ;;  %s412_s2 = scalar_lea.vmem %s280_s14, 128 }
  0x37   :  { %120 = vmatpush1.msra.mxu0 %v77_v18  ;;  %319 = vmatprep.subr.mxu1 %v445_v0  ;;  %v98_v54 = vrot.slane %v93_v53, %v97_v52  ;;  %v102_v59 = vrot.slane %v93_v53, %v101_v58  ;;  %v289_v61 = vld [vmem:[%s518_s4] ss:$0 sm:$0xff]  ;;  %p413_p1 = scmp.ne.s32.totalorder %s280_s14, %s412_s2  ;;  %p418_p3 = scmp.lt.s32.totalorder %s412_s2, %s412_s2 }
  0x38   :  { %121 = vmatprep.subr.mxu0 %v76_v20  ;;  %320 = vmatpush3.msra.mxu1 %v186_v31 }
  0x39   :  { %122 = vmatpush1.msra.mxu0 %v75_v21  ;;  %321 = vmatprep.subr.mxu1 %v445_v0  ;;  %p419_p4 = por %p418_p3, %p417_p2 }
  0x3a   :  { %123 = vmatprep.subr.mxu0 %v74_v23  ;;  %322 = vmatpush3.msra.mxu1 %v185_v34 }
  0x3b   :  { %124 = vmatpush1.msra.mxu0 %v73_v24  ;;  %323 = vmatprep.subr.mxu1 %v445_v0  ;;  %p420_p5 = pnand %p419_p4, %p413_p1 }
  0x3c   :  { %125 = vmatprep.subr.mxu0 %v72_v26  ;;  %324 = vmatpush3.msra.mxu1 %v184_v37 }
  0x3d   :  { %126 = vmatpush1.msra.mxu0 %v71_v27  ;;  %325 = vmatprep.subr.mxu1 %v445_v0 }
  0x3e   :  { %127 = vmatprep.subr.mxu0 %v70_v29  ;;  %326 = vmatpush3.msra.mxu1 %v183_v40 }
  0x3f   :  { %128 = vmatpush1.msra.mxu0 %v69_v30  ;;  %327 = vmatprep.subr.mxu1 %v445_v0 }
  0x40   :  { %129 = vmatprep.subr.mxu0 %v68_v32  ;;  %328 = vmatpush3.msra.mxu1 %v182_v43 }
  0x41   :  { %130 = vmatpush1.msra.mxu0 %v67_v33  ;;  %329 = vmatprep.subr.mxu1 %v445_v0 }
  0x42   :  { %131 = vmatprep.subr.mxu0 %v66_v35  ;;  %330 = vmatpush3.msra.mxu1 %v181_v45 }
  0x43   :  { %132 = vmatpush1.msra.mxu0 %v65_v36  ;;  %331 = vmatprep.subr.mxu1 %v445_v0 }
  0x44   :  { %133 = vmatprep.subr.mxu0 %v64_v38  ;;  %332 = vmatpush3.msra.mxu1 %v180_v46 }
  0x45   :  { %134 = vmatpush1.msra.mxu0 %v63_v39  ;;  %333 = vmatprep.subr.mxu1 %v445_v0 }
  0x46   :  { %135 = vmatprep.subr.mxu0 %v62_v41  ;;  %334 = vmatpush3.msra.mxu1 %v179_v47 }
  0x47   :  { %136 = vmatpush1.msra.mxu0 %v61_v42  ;;  %335 = vmatprep.subr.mxu1 %v445_v0 }
  0x48   :  { %170 = vmatmul.mubr.f32.vlgmr.msra.gmra.mxu0 %v60_v44  ;;  %336 = vmatpush3.msra.mxu1 %v178_v48 }
  0x49   :  { %337 = vmatprep.subr.mxu1 %v445_v0 }
  0x4a   :  { %338 = vmatpush3.msra.mxu1 %v177_v49 }
 0x108   :  { %v171_v55 = vpop.f32.mrf.mxu0 }
 0x109   :  { %v172_v56 = vadd.f32 %v171_v55, %v98_v54 }
 0x10a   :  { %v173_v60 = vpop.f32.mrf.mxu0 }
 0x10b   :  { %v176_v57 = vmax.f32 %v172_v56, 0.0  ;;  %v174_v63 = vadd.f32 %v173_v60, %v102_v59 }
 0x10d   :  { %340 = vmatmul.mubr.f32.vlgmr.msra.gmra.mxu1 %v176_v57 }
 0x1cd   :  { %v266_v62 = vpop.f32.mrf.mxu1 }
 0x1ce   :  { %v267_v0 = vadd.f32 %v289_v61, %v266_v62 }
 0x1cf   :  { %v341_v1 = vpop.f32.mrf.mxu1 }
 0x1d0   :  { %v270_v2 = vadd.f32 %v267_v0, %v174_v63 }
 0x1d2   :  { %v271_v3 = vmax.f32 %v270_v2, 0.0 }
 0x1d4   :  { %272 = vst [vmem:[#allocation8] sm:$0xff] %v271_v3 }
 0x1d5   :  { %423 = shalt.err (!%p420_p5)
}
 0x1d6   :  { %282 = dma.vmem_to_hbm [thread:$0]  %s280_s14, 128, %s519_s5, [#allocation4]  }
 0x1d7   :  { %436 = dma.done.wait [#allocation4], 128  }
 0x1d8   :  { %437 = vsyncadd [#allocation4], 4294967168 }
 0x1d9   :  { %286 = vsyncpa [#allocation3], 1 }
 0x1da   :  { %287 = vsyncpa [#allocation6], 1 }
 0x1db   :  { %288 = vsyncpa [#allocation4], 1 }

</bundles_post_ra>
